<compile_context>
chip_gen: v7x
topology: tpu7x:2x2x1
jax: 0.10.0
libtpu: 0.0.40
codegen_flags: <defaults>
</compile_context>

<pallas_src>
import jax
import jax.numpy as jnp
from jax.experimental import pallas as pl
from jax.experimental.pallas import tpu as pltpu


def _mlp_kernel(x_ref, w1_ref, b1_ref, w2_ref, b2_ref, w3_ref, b3_ref, o_ref):
    # x_ref : (2, TB)   f32   -- batch along lanes
    # w1_ref: (128, 2)  bf16   b1_ref: (128, 1) f32
    # w2_ref: (128,128) bf16   b2_ref: (128, 1) f32
    # w3_ref: (1, 128)  bf16   b3_ref: (1,)     f32 in SMEM
    # o_ref : (1, 1, TB) f32
    x_bf = x_ref[...].astype(jnp.bfloat16)                       # (2, TB), tiny cast

    # Layer 1 on the MXU (K=2 is padded for free by the systolic array).
    h1 = jnp.dot(w1_ref[...], x_bf, preferred_element_type=jnp.float32)   # (128, TB)
    h1 = jnp.maximum(h1 + b1_ref[...], 0.0).astype(jnp.bfloat16)          # f32 VPU, then pack

    # Layer 2 on the MXU.
    h2 = jnp.dot(w2_ref[...], h1, preferred_element_type=jnp.float32)     # (128, TB)
    h2 = jnp.maximum(h2 + b2_ref[...], 0.0).astype(jnp.bfloat16)

    # Layer 3 on the MXU: (1,128) x (128,TB) -> (1,TB); result is lane-dense.
    out = jnp.dot(w3_ref[...], h2, preferred_element_type=jnp.float32) + b3_ref[0]
    o_ref[...] = out[None].astype(o_ref.dtype)                   # (1, 1, TB)


def _pick_tb(batch):
    """Even tile count (>=2, balances v7x's two TensorCores), tile <= ~4K,
    tile a multiple of 256 (lane-dense, (8,128)-aligned)."""
    TB_MAX = 4096
    num_pairs = max(1, pl.cdiv(batch, 2 * TB_MAX))   # num_tiles = 2 * num_pairs (even)
    tb = pl.cdiv(batch, 2 * num_pairs)
    tb = max(256, ((tb + 255) // 256) * 256)
    return tb


def rewarf_predictor(x, params, *, tb=None):
    """x: [B, 2] float32 -> [B, 1] float32."""
    w1, b1, w2, b2, w3, b3 = params
    B = x.shape[0]
    if tb is None:
        tb = _pick_tb(B)
    assert tb % 256 == 0, "tb must be a multiple of 256"

    num_tiles = pl.cdiv(B, tb)

    # Feature-major: batch along lanes.  No explicit pad -- the last grid block
    # is partial; the garbage tail is dropped by the [:B] slice below.
    x_t = x.astype(jnp.float32).T                                # (2, B)

    def const_spec(shape):
        return pl.BlockSpec(shape, lambda i: tuple(0 for _ in shape))

    out = pl.pallas_call(
        _mlp_kernel,
        out_shape=jax.ShapeDtypeStruct((num_tiles, 1, tb), jnp.float32),
        grid_spec=pltpu.PrefetchScalarGridSpec(
            num_scalar_prefetch=0,
            grid=(num_tiles,),
            in_specs=[
                pl.BlockSpec((2, tb), lambda i: (0, i)),           # x tile (batch on lanes)
                const_spec(w1.shape), const_spec(b1.shape),        # VMEM-resident weights
                const_spec(w2.shape), const_spec(b2.shape),
                const_spec(w3.shape),
                pl.BlockSpec(memory_space=pltpu.MemorySpace.SMEM), # b3 scalar in SMEM
            ],
            out_specs=pl.BlockSpec((1, 1, tb), lambda i: (i, 0, 0)),
        ),
        compiler_params=pltpu.CompilerParams(
            dimension_semantics=("parallel",),          # megacore batch split on v7x
            vmem_limit_bytes=32 * 1024 * 1024,          # headroom for large TB on v5e
        ),
    )(x_t, w1, b1, w2, b2, w3, b3)

    # Lane-dense slab -> (B, 1); pure layout plumbing in the wrapper.
    return out.reshape(num_tiles * tb)[:B].reshape(B, 1)


def init_params(key):
    """PyTorch nn.Linear default init (U[-1/sqrt(fan_in), +1/sqrt(fan_in)]).
    Matmul weights stored in bf16 for the MXU (w1: [128,2], w2: [128,128],
    w3 as a [1,128] row); biases f32, b1/b2 as [fan_out,1] columns, b3 as (1,)."""
    def linear(key, fan_in, fan_out):
        kw, kb = jax.random.split(key)
        bound = 1.0 / jnp.sqrt(float(fan_in))
        w = jax.random.uniform(kw, (fan_out, fan_in), jnp.float32, -bound, bound)
        b = jax.random.uniform(kb, (fan_out, 1), jnp.float32, -bound, bound)
        return w, b

    k1, k2, k3 = jax.random.split(key, 3)
    w1, b1 = linear(k1, 2, 128)            # (128, 2), (128, 1)
    w2, b2 = linear(k2, 128, 128)          # (128, 128), (128, 1)
    w3, b3 = linear(k3, 128, 1)            # (1, 128), (1, 1)
    return (w1.astype(jnp.bfloat16), b1,
            w2.astype(jnp.bfloat16), b2,
            w3.astype(jnp.bfloat16),        # (1, 128) row
            b3.reshape(1))                  # (1,) scalar for SMEM


def _reference(x, params):
    # f32 reference using the same (bf16-stored) weights; bf16 MXU path in the
    # kernel is the only source of deviation -> loosened tolerance below.
    w1, b1, w2, b2, w3, b3 = params
    h = jnp.maximum(x @ w1.astype(jnp.float32).T + b1.reshape(1, -1), 0.0)
    h = jnp.maximum(h @ w2.astype(jnp.float32).T + b2.reshape(1, -1), 0.0)
    return h @ w3.astype(jnp.float32).T + b3.reshape(1, 1)


if __name__ == "__main__":
    key = jax.random.PRNGKey(0)
    kx, kp = jax.random.split(key)

    B = 300                                  # not a tile multiple: exercises partial last block
    x = jax.random.normal(kx, (B, 2), jnp.float32)
    params = init_params(kp)

    out = rewarf_predictor(x, params)        # auto tb -> 256, 2 grid steps
    out = jax.block_until_ready(out)

    ref = _reference(x, params)
    assert out.shape == (B, 1), out.shape
    # bf16 MXU path on all three layers -> loosened tolerance vs the f32 reference.
    assert jnp.allclose(out, ref, atol=5e-2, rtol=5e-2), "mismatch vs reference"

    print("KERNEL_OK")
</pallas_src>

<mosaic_0001>
module attributes {stable_mosaic.version = 11 : i64} {
  func.func @_mlp_kernel(%arg0: i32, %arg1: memref<2x256xf32, #tpu.memory_space<vmem>>, %arg2: memref<128x2xbf16, #tpu.memory_space<vmem>>, %arg3: memref<128x1xf32, #tpu.memory_space<vmem>>, %arg4: memref<128x128xbf16, #tpu.memory_space<vmem>>, %arg5: memref<128x1xf32, #tpu.memory_space<vmem>>, %arg6: memref<1x128xbf16, #tpu.memory_space<vmem>>, %arg7: memref<1xf32, #tpu.memory_space<smem>>, %arg8: memref<1x1x256xf32, #tpu.memory_space<vmem>>) attributes {dimension_semantics = [#tpu.dimension_semantics<parallel>], iteration_bounds = array<i64: 2>, scalar_prefetch = 0 : i64, scratch_operands = 0 : i64, tpu.core_type = #tpu.core_type<tc>, window_params = [{transform_indices = @transform_0, window_bounds = array<i64: 2, 256>}, {pipeline_mode = #tpu.pipeline_mode<synchronous>, transform_indices = @transform_1, window_bounds = array<i64: 128, 2>}, {pipeline_mode = #tpu.pipeline_mode<synchronous>, transform_indices = @transform_2, window_bounds = array<i64: 128, 1>}, {pipeline_mode = #tpu.pipeline_mode<synchronous>, transform_indices = @transform_3, window_bounds = array<i64: 128, 128>}, {pipeline_mode = #tpu.pipeline_mode<synchronous>, transform_indices = @transform_4, window_bounds = array<i64: 128, 1>}, {pipeline_mode = #tpu.pipeline_mode<synchronous>, transform_indices = @transform_5, window_bounds = array<i64: 1, 128>}, {transform_indices = @transform_6, window_bounds = array<i64: 1>}, {transform_indices = @transform_7, window_bounds = array<i64: 1, 1, 256>}]} {
    %c0 = arith.constant 0 : index
    %c0_0 = arith.constant 0 : index
    %0 = vector.load %arg1[%c0, %c0_0] : memref<2x256xf32, #tpu.memory_space<vmem>>, vector<2x256xf32>
    %1 = arith.truncf %0 : vector<2x256xf32> to vector<2x256xbf16>
    %c0_1 = arith.constant 0 : index
    %c0_2 = arith.constant 0 : index
    %2 = vector.load %arg2[%c0_1, %c0_2] : memref<128x2xbf16, #tpu.memory_space<vmem>>, vector<128x2xbf16>
    %cst = arith.constant dense<0.000000e+00> : vector<128x256xf32>
    %3 = tpu.matmul %2, %1, %cst {dimension_numbers = #tpu.dot_dimension_numbers<[1], [0], [0], [1], [0, 0, 1, 1], [], []>} : vector<128x2xbf16>, vector<2x256xbf16>, vector<128x256xf32> -> vector<128x256xf32>
    %c0_3 = arith.constant 0 : index
    %c0_4 = arith.constant 0 : index
    %4 = vector.load %arg3[%c0_3, %c0_4] : memref<128x1xf32, #tpu.memory_space<vmem>>, vector<128x1xf32>
    %5 = vector.broadcast %4 : vector<128x1xf32> to vector<128x256xf32>
    %6 = arith.addf %3, %5 : vector<128x256xf32>
    %cst_5 = arith.constant 0.000000e+00 : f32
    %7 = vector.broadcast %cst_5 : f32 to vector<128x256xf32>
    %8 = arith.maximumf %6, %7 : vector<128x256xf32>
    %9 = arith.truncf %8 : vector<128x256xf32> to vector<128x256xbf16>
    %c0_6 = arith.constant 0 : index
    %c0_7 = arith.constant 0 : index
    %10 = vector.load %arg4[%c0_6, %c0_7] : memref<128x128xbf16, #tpu.memory_space<vmem>>, vector<128x128xbf16>
    %cst_8 = arith.constant dense<0.000000e+00> : vector<128x256xf32>
    %11 = tpu.matmul %10, %9, %cst_8 {dimension_numbers = #tpu.dot_dimension_numbers<[1], [0], [0], [1], [0, 0, 1, 1], [], []>} : vector<128x128xbf16>, vector<128x256xbf16>, vector<128x256xf32> -> vector<128x256xf32>
    %c0_9 = arith.constant 0 : index
    %c0_10 = arith.constant 0 : index
    %12 = vector.load %arg5[%c0_9, %c0_10] : memref<128x1xf32, #tpu.memory_space<vmem>>, vector<128x1xf32>
    %13 = vector.broadcast %12 : vector<128x1xf32> to vector<128x256xf32>
    %14 = arith.addf %11, %13 : vector<128x256xf32>
    %cst_11 = arith.constant 0.000000e+00 : f32
    %15 = vector.broadcast %cst_11 : f32 to vector<128x256xf32>
    %16 = arith.maximumf %14, %15 : vector<128x256xf32>
    %17 = arith.truncf %16 : vector<128x256xf32> to vector<128x256xbf16>
    %c0_12 = arith.constant 0 : index
    %c0_13 = arith.constant 0 : index
    %18 = vector.load %arg6[%c0_12, %c0_13] : memref<1x128xbf16, #tpu.memory_space<vmem>>, vector<1x128xbf16>
    %cst_14 = arith.constant dense<0.000000e+00> : vector<1x256xf32>
    %19 = tpu.matmul %18, %17, %cst_14 {dimension_numbers = #tpu.dot_dimension_numbers<[1], [0], [0], [1], [0, 0, 1, 1], [], []>} : vector<1x128xbf16>, vector<128x256xbf16>, vector<1x256xf32> -> vector<1x256xf32>
    %c0_15 = arith.constant 0 : index
    %20 = memref.load %arg7[%c0_15] : memref<1xf32, #tpu.memory_space<smem>>
    %21 = vector.broadcast %20 : f32 to vector<1x256xf32>
    %22 = arith.addf %19, %21 : vector<1x256xf32>
    %23 = vector.shape_cast %22 : vector<1x256xf32> to vector<1x1x256xf32>
    %c0_16 = arith.constant 0 : index
    %c0_17 = arith.constant 0 : index
    %c0_18 = arith.constant 0 : index
    %24 = vector.load %arg8[%c0_16, %c0_17, %c0_18] : memref<1x1x256xf32, #tpu.memory_space<vmem>>, vector<1x1x256xf32>
    tpu.vector_store %arg8[%c0_16, %c0_17, %c0_18], %23 {strides = array<i32>} : memref<1x1x256xf32, #tpu.memory_space<vmem>>, vector<1x1x256xf32>,
    return
  }
  func.func @transform_0(%arg0: i32) -> (i32, i32) {
    %c0_i32 = arith.constant 0 : i32
    %c0_i32_0 = arith.constant 0 : i32
    return %c0_i32, %arg0 : i32, i32
  }
  func.func @transform_1(%arg0: i32) -> (i32, i32) {
    %c0_i32 = arith.constant 0 : i32
    %c0_i32_0 = arith.constant 0 : i32
    %c0_i32_1 = arith.constant 0 : i32
    return %c0_i32, %c0_i32_0 : i32, i32
  }
  func.func @transform_2(%arg0: i32) -> (i32, i32) {
    %c0_i32 = arith.constant 0 : i32
    %c0_i32_0 = arith.constant 0 : i32
    %c0_i32_1 = arith.constant 0 : i32
    return %c0_i32, %c0_i32_0 : i32, i32
  }
  func.func @transform_3(%arg0: i32) -> (i32, i32) {
    %c0_i32 = arith.constant 0 : i32
    %c0_i32_0 = arith.constant 0 : i32
    %c0_i32_1 = arith.constant 0 : i32
    return %c0_i32, %c0_i32_0 : i32, i32
  }
  func.func @transform_4(%arg0: i32) -> (i32, i32) {
    %c0_i32 = arith.constant 0 : i32
    %c0_i32_0 = arith.constant 0 : i32
    %c0_i32_1 = arith.constant 0 : i32
    return %c0_i32, %c0_i32_0 : i32, i32
  }
  func.func @transform_5(%arg0: i32) -> (i32, i32) {
    %c0_i32 = arith.constant 0 : i32
    %c0_i32_0 = arith.constant 0 : i32
    %c0_i32_1 = arith.constant 0 : i32
    return %c0_i32, %c0_i32_0 : i32, i32
  }
  func.func @transform_6(%arg0: i32) -> i32 {
    %c0_i32 = arith.constant 0 : i32
    %c0_i32_0 = arith.constant 0 : i32
    return %c0_i32 : i32
  }
  func.func @transform_7(%arg0: i32) -> (i32, i32, i32) {
    %c0_i32 = arith.constant 0 : i32
    %c0_i32_0 = arith.constant 0 : i32
    %c0_i32_1 = arith.constant 0 : i32
    return %arg0, %c0_i32, %c0_i32_0 : i32, i32, i32
  }
}

</mosaic_0001>

<bundles_post_ra>
// kernel: tpu_custom_call.1
= control target key start
LH: loop header
LB: loop body
LE: loop exit
PB: predicated region body
PF: predicated region fallthrough
CT: control target
= control target key end

     0   :  { %s1603_s0 = inlined_call_operand.vmem [shape: f32[2,300], index: 0, kind: input, shape index: {}]   ;;  %s1604_s1 = inlined_call_operand.vmem [shape: bf16[128,2], index: 1, kind: input, shape index: {}]   ;;  %s1605_s2 = inlined_call_operand.vmem [shape: f32[128,1], index: 2, kind: input, shape index: {}]   ;;  %s1606_s3 = inlined_call_operand.vmem [shape: bf16[128,128], index: 3, kind: input, shape index: {}]   ;;  %s1607_s4 = inlined_call_operand.vmem [shape: f32[128,1], index: 4, kind: input, shape index: {}]   ;;  %s1608_s5 = inlined_call_operand.vmem [shape: bf16[1,128], index: 5, kind: input, shape index: {}]   ;;  %s1609_s6 = inlined_call_operand.<no memory space> [shape: f32[1], index: 6, kind: input, shape index: {}]   ;;  %s1610_s7 = inlined_call_operand.hbm [shape: f32[2,1,256], index: 7, kind: output, shape index: {}]  }
   0x1   :  { %12 = sst [smem:[#allocation2]] %s1609_s6 }
   0x2   :  { %13 = vsyncpa [#allocation4], 0 }
   0x3   :  { %15 = vsyncpa [#allocation4 + $0x1], 0  ;;  %s1330_s26 = smov 0   ;;  %s1332_s27 = smov 0  }
   0x4   :  { %s1334_s28 = smov 0   ;;  %s1336_s29 = smov 0  }
   0x5 LB: > { %s1351_s6 = sadd.s32 4294967295, %s1282_s29   ;;  %s1122_s30 = sadd.s32 4294967294, %s1282_s29   ;;  %s1282_s29 = sphi %s1336_s29, %s1616_s29   ;;  %s1278_s28 = sphi %s1334_s28, %s1615_s28   ;;  %s1274_s27 = sphi %s1332_s27, %s1614_s27   ;;  %s1270_s26 = sphi %s1330_s26, %s1613_s26  }
   0x6   : > { %s1355_s8 = sadd.s32 1, %s1282_s29   ;;  %s180_s9 = sadd.s32 1, %s1278_s28 }
   0x7   : > { %s177_s10 = ssub.s32 %s1282_s29, %s1355_s8  ;;  %p190_p0 = scmp.ne.s32.totalorder %s1278_s28, %s1274_s27 }
   0x8   : > { %p178_p1 = scmp.eq.s32.totalorder %s177_s10, 0  ;;  %p191_p2 = scmp.eq.s32.totalorder %s1351_s6, 1 }
   0x9   : > { %p196_p3 = scmp.ne.s32.totalorder %s1274_s27, %s1270_s26  ;;  %p197_p4 = scmp.eq.s32.totalorder %s1122_s30, 1 }
   0xa   : > { %s1366_s11 = scalar_select %p178_p1, %s1278_s28, %s180_s9  }
   0xb   : > { %p1368_p5 = por %p191_p2, %p190_p0  ;;  %p1372_p6 = por %p197_p4, %p196_p3 }
   0xc   : > { %p1125_p7 = scmp.ge.s32.totalorder %s1282_s29, 1  ;;  %p250_p8 = scmp.lt.s32.totalorder %s1282_s29, 3 }
   0xe   : > { %p251_p9 = pnand %p1125_p7, %p250_p8 }
   0xf   : > { %s1127_s14 = sshll.u32 (!%p251_p9), %s1351_s6, 1  ;;  %v1284_v0 = vmov (!%p251_p9), 0   ;;  %vm492_vm0 = vcmask (!%p251_p9), 1040384   ;;  %v331_v4 = vld [vmem:[%s1605_s2] sm:$0xff] (!%p251_p9)  ;;  %v333_v5 = vld [vmem:[%s1605_s2 + $0x10] sm:$0xff] (!%p251_p9)  ;;  %v332_v8 = vld [vmem:[%s1605_s2 + $0x8] sm:$0xff] (!%p251_p9) }
  0x10   : > { %254 = sbr.rel (%p251_p9) target bundleno = 832 (0x340), region = 48  ;;  %p291_p10 = scmp.lt.s32.totalorder (!%p251_p9), %s1127_s14, 2  ;;  %531 = vmatprep.mubr.bf16.mxu0 (!%p251_p9), %v1284_v0  ;;  %1202 = vset.pattern.permute.xlu0 (!%p251_p9), %v1284_v0  ;;  %v334_v9 = vld [vmem:[%s1605_s2 + $0x18] sm:$0xff] (!%p251_p9)  ;;  %v1204_v10 = vld [vmem:[%s1604_s1] sm:$0xff] (!%p251_p9)   ;;  %vm467_vm1 = vcmask (!%p251_p9), 15360   ;;  %v336_v12 = vld [vmem:[%s1605_s2 + $0x28] sm:$0xff] (!%p251_p9) }
  0x11   : > { %1203 = vset.pattern.permute.xlu1 (!%p251_p9), %v1284_v0  ;;  %852 = vmatprep.mubr.bf16.mxu1 (!%p251_p9), %v1284_v0  ;;  %v335_v11 = vld [vmem:[%s1605_s2 + $0x20] sm:$0xff] (!%p251_p9)  ;;  %v337_v13 = vld [vmem:[%s1605_s2 + $0x30] sm:$0xff] (!%p251_p9)  ;;  %v1205_v14 = vld [vmem:[%s1604_s1 + $0x8] sm:$0xff] (!%p251_p9)   ;;  %s982_s9 = sld [smem:[#allocation2]] (!%p251_p9)  ;;  %s283_s10 = sand.u32 (!%p251_p9), 1, %s1274_s27  }
  0x12   : > { %349 = vperm.xlu0 (!%p251_p9), %1202, %v331_v4   ;;  %359 = vperm.xlu1 (!%p251_p9), %1203, %v333_v5   ;;  %v338_v15 = vld [vmem:[%s1605_s2 + $0x38] sm:$0xff] (!%p251_p9)  ;;  %v339_v16 = vld [vmem:[%s1605_s2 + $0x40] sm:$0xff] (!%p251_p9)  ;;  %v340_v17 = vld [vmem:[%s1605_s2 + $0x48] sm:$0xff] (!%p251_p9)  ;;  %s1049_s21 = scalar_lea.sflag (!%p251_p9), [#allocation4], %s283_s10 }
  0x13   : > { %v341_v18 = vld [vmem:[%s1605_s2 + $0x50] sm:$0xff] (!%p251_p9)  ;;  %v342_v19 = vld [vmem:[%s1605_s2 + $0x58] sm:$0xff] (!%p251_p9)  ;;  %v343_v21 = vld [vmem:[%s1605_s2 + $0x60] sm:$0xff] (!%p251_p9) }
  0x14   : > { %v1206_v20 = vld [vmem:[%s1604_s1 + $0x10] sm:$0xff] (!%p251_p9)   ;;  %v344_v22 = vld [vmem:[%s1605_s2 + $0x68] sm:$0xff] (!%p251_p9)  ;;  %v346_v24 = vld [vmem:[%s1605_s2 + $0x78] sm:$0xff] (!%p251_p9) }
  0x15   : > { %v345_v23 = vld [vmem:[%s1605_s2 + $0x70] sm:$0xff] (!%p251_p9)  ;;  %v1207_v25 = vld [vmem:[%s1604_s1 + $0x18] sm:$0xff] (!%p251_p9)   ;;  %v676_v26 = vld [vmem:[%s1607_s4] sm:$0xff] (!%p251_p9) }
  0x16   : > { %354 = vperm.xlu0 (!%p251_p9), %1202, %v332_v8   ;;  %364 = vperm.xlu1 (!%p251_p9), %1203, %v334_v9   ;;  %v677_v27 = vld [vmem:[%s1607_s4 + $0x8] sm:$0xff] (!%p251_p9)  ;;  %v678_v28 = vld [vmem:[%s1607_s4 + $0x10] sm:$0xff] (!%p251_p9)  ;;  %v679_v29 = vld [vmem:[%s1607_s4 + $0x18] sm:$0xff] (!%p251_p9) }
  0x17   : > { %s1618_s14 = smov (!%p291_p10, %s1127_s14), 2  ;;  %v1208_v30 = vld [vmem:[%s1604_s1 + $0x20] sm:$0xff]   ;;  %v681_v32 = vld [vmem:[%s1607_s4 + $0x28] sm:$0xff]  ;;  %v682_v33 = vld [vmem:[%s1607_s4 + $0x30] sm:$0xff] }
  0x18   : > { %s1128_s15 = sshll.u32 %s1618_s14, 1  ;;  %v680_v31 = vld [vmem:[%s1607_s4 + $0x20] sm:$0xff]  ;;  %v683_v34 = vld [vmem:[%s1607_s4 + $0x38] sm:$0xff]  ;;  %v1209_v35 = vld [vmem:[%s1604_s1 + $0x28] sm:$0xff]   ;;  %s1126_s14 = sshll.u32 %s283_s10, 1 }
  0x19   : > { %s294_s18 = scalar_lea.vmem %s1603_s0, %s1128_s15  ;;  %v684_v36 = vld [vmem:[%s1607_s4 + $0x40] sm:$0xff]  ;;  %v685_v37 = vld [vmem:[%s1607_s4 + $0x48] sm:$0xff]  ;;  %v686_v38 = vld [vmem:[%s1607_s4 + $0x50] sm:$0xff]  ;;  %s1160_s15 = sshll.u32 %s1351_s6, 5 }
  0x1a   : > { %v1129_v1 = vld.sshfl [vmem:[%s294_s18] sm:$0x33 pattern:$0x76325410]  ;;  %369 = vperm.xlu0 %1202, %v335_v11   ;;  %374 = vperm.xlu1 %1203, %v336_v12   ;;  %v687_v39 = vld [vmem:[%s1607_s4 + $0x58] sm:$0xff]  ;;  %v1210_v40 = vld [vmem:[%s1604_s1 + $0x30] sm:$0xff]   ;;  %s1561_s20 = scalar_lea.hbm %s1610_s7, %s1160_s15 }
  0x1b   : > { %v310_v2 = vcombine.high %v1129_v1, %v1129_v1  ;;  %v313_v3 = vpack.c.bf16 %v1129_v1, %v1129_v1  ;;  %v688_v41 = vld [vmem:[%s1607_s4 + $0x60] sm:$0xff]  ;;  %v689_v42 = vld [vmem:[%s1607_s4 + $0x68] sm:$0xff]  ;;  %v690_v43 = vld [vmem:[%s1607_s4 + $0x70] sm:$0xff]  ;;  %s285_s16 = scalar_lea.vmem [#allocation3], %s1126_s14  ;;  %s1286_s6 = smov [#allocation3]  }
  0x1c   : > { %v691_v44 = vld [vmem:[%s1607_s4 + $0x78] sm:$0xff]  ;;  %s1063_s17 = sshll.u32 %s285_s16, 4  ;;  %s1224_s23 = sshll.u32 %s1286_s6, 4  ;;  %s1563_s17 = int_to_ptr.vmem [resolvable:$true] %s1063_s17  ;;  %s1225_s23 = int_to_ptr.vmem [resolvable:$false] %s1224_s23 }
  0x1d   : > { %v314_v6 = vpack.c.bf16 %v310_v2, %v310_v2  ;;  %v494_v7 = vsel %vm492_vm0, %v313_v3, 0  ;;  %v1211_v45 = vld [vmem:[%s1604_s1 + $0x38] sm:$0xff]   ;;  %s1220_s22 = scalar_lea.vmem %s1563_s17, 32  ;;  %s1226_s24 = scalar_lea.vmem %s1225_s23, 64 }
  0x1e   : > { %379 = vperm.xlu0 %1202, %v337_v13   ;;  %384 = vperm.xlu1 %1203, %v338_v15   ;;  %p1221_p11 = scmp.ne.s32.totalorder %s1563_s17, %s1220_s22  ;;  %p1227_p0 = scmp.lt.s32.totalorder %s1563_s17, %s1225_s23 }
  0x1f   : > { %1138 = vmatprep.subr.msk.bf16.mxu0 %vm492_vm0, %v314_v6  ;;  %p1228_p1 = scmp.lt.s32.totalorder %s1226_s24, %s1220_s22 }
  0x20   : > { %500 = vmatpush1.bf16.msra.mxu0 %v494_v7  ;;  %p1222_p12 = pnand %p1221_p11, %p1368_p5 }
  0x21   : > { %p1229_p2 = por %p1228_p1, %p1227_p0 }
  0x22   : > { %389 = vperm.xlu0 %1202, %v339_v16   ;;  %394 = vperm.xlu1 %1203, %v340_v17   ;;  %p1223_p13 = pneg %p1222_p12 }
  0x23   : > { %1139 = vmatmul.mubr.msk.bf16.vlgmr.msra.gmra.mrb[0].mxu0 %vm467_vm1, %v1204_v10 }
  0x24   : > { %541 = vmatprep.mubr.bf16.mxu0 %v1284_v0  ;;  %p1230_p3 = pnand %p1229_p2, %p1223_p13 }
  0x26   : > { %399 = vperm.xlu0 %1202, %v341_v18   ;;  %404 = vperm.xlu1 %1203, %v342_v19  }
  0x2a   : > { %409 = vperm.xlu0 %1202, %v343_v21   ;;  %414 = vperm.xlu1 %1203, %v344_v22  }
  0x2b   : > { %1140 = vmatmul.mubr.msk.bf16.gmra.mrb[4].mxu0 %vm467_vm1, %v1205_v14 }
  0x2c   : > { %551 = vmatprep.mubr.bf16.mxu0 %v1284_v0 }
  0x2e   : > { %419 = vperm.xlu0 %1202, %v345_v23   ;;  %424 = vperm.xlu1 %1203, %v346_v24  }
  0x32   : > { %694 = vperm.xlu0 %1202, %v676_v26   ;;  %699 = vperm.xlu1 %1203, %v677_v27  }
  0x33   : > { %1141 = vmatmul.mubr.msk.bf16.gmra.mrb[8].mxu0 %vm467_vm1, %v1206_v20 }
  0x34   : > { %561 = vmatprep.mubr.bf16.mxu0 %v1284_v0 }
  0x36   : > { %704 = vperm.xlu0 %1202, %v678_v28   ;;  %709 = vperm.xlu1 %1203, %v679_v29  }
  0x3a   : > { %714 = vperm.xlu0 %1202, %v680_v31   ;;  %719 = vperm.xlu1 %1203, %v681_v32  }
  0x3b   : > { %1142 = vmatmul.mubr.msk.bf16.gmra.mrb[12].mxu0 %vm467_vm1, %v1207_v25 }
  0x3c   : > { %571 = vmatprep.mubr.bf16.mxu0 %v1284_v0 }
  0x3e   : > { %724 = vperm.xlu0 %1202, %v682_v33   ;;  %729 = vperm.xlu1 %1203, %v683_v34  }
  0x42   : > { %734 = vperm.xlu0 %1202, %v684_v36   ;;  %739 = vperm.xlu1 %1203, %v685_v37  }
  0x43   : > { %1143 = vmatmul.mubr.msk.bf16.gmra.mrb[16].mxu0 %vm467_vm1, %v1208_v30 }
  0x44   : > { %581 = vmatprep.mubr.bf16.mxu0 %v1284_v0 }
  0x46   : > { %744 = vperm.xlu0 %1202, %v686_v38   ;;  %749 = vperm.xlu1 %1203, %v687_v39  }
  0x4a   : > { %754 = vperm.xlu0 %1202, %v688_v41   ;;  %759 = vperm.xlu1 %1203, %v689_v42  }
  0x4b   : > { %1144 = vmatmul.mubr.msk.bf16.gmra.mrb[20].mxu0 %vm467_vm1, %v1209_v35 }
  0x4c   : > { %591 = vmatprep.mubr.bf16.mxu0 %v1284_v0 }
  0x4e   : > { %764 = vperm.xlu0 %1202, %v690_v43   ;;  %769 = vperm.xlu1 %1203, %v691_v44  }
  0x53   : > { %1145 = vmatmul.mubr.msk.bf16.gmra.mrb[24].mxu0 %vm467_vm1, %v1210_v40 }
  0x54   : > { %601 = vmatprep.mubr.bf16.mxu0 %v1284_v0 }
  0x5b   : > { %1146 = vmatmul.mubr.msk.bf16.gmra.mrb[28].mxu0 %vm467_vm1, %v1211_v45 }
  0x5c   : > { %1016 = vmatprep.mubr.bf16.mxu0 %v1284_v0 }
  0x91   : > { %v350_v46 = vpop.permute.xlu0 %349  ;;  %v360_v55 = vpop.permute.xlu1 %359 }
  0x95   : > { %v355_v50 = vpop.permute.xlu0 %354  ;;  %v365_v3 = vpop.permute.xlu1 %364 }
  0x99   : > { %v370_v14 = vpop.permute.xlu0 %369  ;;  %v375_v19 = vpop.permute.xlu1 %374 }
  0x9d   : > { %v380_v30 = vpop.permute.xlu0 %379  ;;  %v385_v35 = vpop.permute.xlu1 %384 }
  0xf6   : > { %v533_v47 = vpop.f32.mrb[0].mxu0 }
  0xf7   : > { %v534_v48 = vadd.f32 %v533_v47, %v350_v46  ;;  %v535_v49 = vpop.f32.mrb[1].mxu0 }
  0xf8   : > { %v536_v51 = vadd.f32 %v535_v49, %v350_v46  ;;  %v537_v52 = vpop.f32.mrb[2].mxu0  ;;  %v390_v46 = vpop.permute.xlu0 %389 }
  0xf9   : > { %v538_v53 = vadd.f32 %v537_v52, %v355_v50  ;;  %v539_v54 = vpop.f32.mrb[3].mxu0  ;;  %v612_v57 = vmax.f32 %v534_v48, 0.0 }
  0xfa   : > { %v540_v56 = vadd.f32 %v539_v54, %v355_v50  ;;  %v613_v59 = vmax.f32 %v536_v51, 0.0  ;;  %v395_v51 = vpop.permute.xlu1 %394 }
  0xfb   : > { %v614_v58 = vmax.f32 %v538_v53, 0.0 }
  0xfc   : > { %v615_v60 = vmax.f32 %v540_v56, 0.0 }
  0xfd   : > { %v644_v61 = vpack.c.bf16 %v614_v58, %v612_v57 }
  0xfe   : > { %v543_v62 = vpop.f32.mrb[4].mxu0  ;;  %v645_v63 = vpack.c.bf16 %v615_v60, %v613_v59 }
  0xff   : > { %v544_v1 = vadd.f32 %v543_v62, %v360_v55  ;;  %v545_v2 = vpop.f32.mrb[5].mxu0  ;;  %v400_v62 = vpop.permute.xlu0 %399 }
 0x100   : > { %v546_v4 = vadd.f32 %v545_v2, %v360_v55  ;;  %v547_v5 = vpop.f32.mrb[6].mxu0  ;;  %820 = vmatprep.subr.bf16.mxu1 %v645_v63 }
 0x101   : > { %v548_v6 = vadd.f32 %v547_v5, %v365_v3  ;;  %v549_v7 = vpop.f32.mrb[7].mxu0  ;;  %821 = vmatpush1.bf16.msra.mxu1 %v644_v61  ;;  %v616_v9 = vmax.f32 %v544_v1, 0.0 }
 0x102   : > { %v550_v8 = vadd.f32 %v549_v7, %v365_v3  ;;  %v617_v11 = vmax.f32 %v546_v4, 0.0  ;;  %v405_v4 = vpop.permute.xlu1 %404 }
 0x103   : > { %v618_v10 = vmax.f32 %v548_v6, 0.0 }
 0x104   : > { %v619_v12 = vmax.f32 %v550_v8, 0.0 }
 0x105   : > { %v646_v13 = vpack.c.bf16 %v618_v10, %v616_v9 }
 0x106   : > { %v647_v15 = vpack.c.bf16 %v619_v12, %v617_v11  ;;  %v553_v16 = vpop.f32.mrb[8].mxu0 }
 0x107   : > { %v554_v17 = vadd.f32 %v553_v16, %v370_v14  ;;  %v555_v18 = vpop.f32.mrb[9].mxu0 }
 0x108   : > { %v556_v20 = vadd.f32 %v555_v18, %v370_v14  ;;  %v557_v21 = vpop.f32.mrb[10].mxu0  ;;  %822 = vmatprep.subr.bf16.mxu1 %v647_v15  ;;  %v410_v15 = vpop.permute.xlu0 %409 }
 0x109   : > { %v558_v22 = vadd.f32 %v557_v21, %v375_v19  ;;  %v559_v23 = vpop.f32.mrb[11].mxu0  ;;  %823 = vmatpush1.bf16.msra.mxu1 %v646_v13  ;;  %v620_v25 = vmax.f32 %v554_v17, 0.0 }
 0x10a   : > { %v560_v24 = vadd.f32 %v559_v23, %v375_v19  ;;  %v621_v27 = vmax.f32 %v556_v20, 0.0  ;;  %v415_v20 = vpop.permute.xlu1 %414 }
 0x10b   : > { %v622_v26 = vmax.f32 %v558_v22, 0.0 }
 0x10c   : > { %v623_v28 = vmax.f32 %v560_v24, 0.0 }
 0x10d   : > { %v648_v29 = vpack.c.bf16 %v622_v26, %v620_v25 }
 0x10e   : > { %v649_v31 = vpack.c.bf16 %v623_v28, %v621_v27  ;;  %v563_v32 = vpop.f32.mrb[12].mxu0 }
 0x10f   : > { %v564_v33 = vadd.f32 %v563_v32, %v380_v30  ;;  %v565_v34 = vpop.f32.mrb[13].mxu0 }
 0x110   : > { %v566_v36 = vadd.f32 %v565_v34, %v380_v30  ;;  %v567_v37 = vpop.f32.mrb[14].mxu0  ;;  %824 = vmatprep.subr.bf16.mxu1 %v649_v31  ;;  %v420_v31 = vpop.permute.xlu0 %419 }
 0x111   : > { %v568_v38 = vadd.f32 %v567_v37, %v385_v35  ;;  %v569_v39 = vpop.f32.mrb[15].mxu0  ;;  %825 = vmatpush1.bf16.msra.mxu1 %v648_v29  ;;  %v624_v41 = vmax.f32 %v564_v33, 0.0 }
 0x112   : > { %v570_v40 = vadd.f32 %v569_v39, %v385_v35  ;;  %v625_v43 = vmax.f32 %v566_v36, 0.0  ;;  %v425_v36 = vpop.permute.xlu1 %424 }
 0x113   : > { %v626_v42 = vmax.f32 %v568_v38, 0.0 }
 0x114   : > { %v627_v44 = vmax.f32 %v570_v40, 0.0 }
 0x115   : > { %v650_v45 = vpack.c.bf16 %v626_v42, %v624_v41 }
 0x116   : > { %v651_v47 = vpack.c.bf16 %v627_v44, %v625_v43  ;;  %v573_v48 = vpop.f32.mrb[16].mxu0 }
 0x117   : > { %v574_v49 = vadd.f32 %v573_v48, %v390_v46  ;;  %v575_v50 = vpop.f32.mrb[17].mxu0  ;;  %v1212_v48 = vld [vmem:[%s1606_s3] sm:$0xff]  }
 0x118   : > { %v576_v52 = vadd.f32 %v575_v50, %v390_v46  ;;  %v577_v53 = vpop.f32.mrb[18].mxu0  ;;  %826 = vmatprep.subr.bf16.mxu1 %v651_v47  ;;  %v1214_v50 = vld [vmem:[%s1606_s3 + $0x10] sm:$0xff]  }
 0x119   : > { %v578_v54 = vadd.f32 %v577_v53, %v395_v51  ;;  %v579_v55 = vpop.f32.mrb[19].mxu0  ;;  %827 = vmatpush1.bf16.msra.mxu1 %v650_v45  ;;  %v628_v57 = vmax.f32 %v574_v49, 0.0  ;;  %v1213_v49 = vld [vmem:[%s1606_s3 + $0x8] sm:$0xff]  }
 0x11a   : > { %v580_v56 = vadd.f32 %v579_v55, %v395_v51  ;;  %v629_v59 = vmax.f32 %v576_v52, 0.0  ;;  %v1215_v51 = vld [vmem:[%s1606_s3 + $0x18] sm:$0xff]   ;;  %v1216_v52 = vld [vmem:[%s1606_s3 + $0x20] sm:$0xff]   ;;  %v1217_v53 = vld [vmem:[%s1606_s3 + $0x28] sm:$0xff]  }
 0x11b   : > { %v630_v58 = vmax.f32 %v578_v54, 0.0  ;;  %v1218_v54 = vld [vmem:[%s1606_s3 + $0x30] sm:$0xff]   ;;  %v1219_v55 = vld [vmem:[%s1606_s3 + $0x38] sm:$0xff]  }
 0x11c   : > { %v631_v60 = vmax.f32 %v580_v56, 0.0  ;;  %v695_v56 = vpop.permute.xlu0 %694 }
 0x11d   : > { %v652_v61 = vpack.c.bf16 %v630_v58, %v628_v57 }
 0x11e   : > { %v653_v63 = vpack.c.bf16 %v631_v60, %v629_v59  ;;  %v583_v1 = vpop.f32.mrb[20].mxu0  ;;  %v700_v60 = vpop.permute.xlu1 %699 }
 0x11f   : > { %v584_v2 = vadd.f32 %v583_v1, %v400_v62  ;;  %v585_v3 = vpop.f32.mrb[21].mxu0 }
 0x120   : > { %v586_v5 = vadd.f32 %v585_v3, %v400_v62  ;;  %v587_v6 = vpop.f32.mrb[22].mxu0  ;;  %828 = vmatprep.subr.bf16.mxu1 %v653_v63 }
 0x121   : > { %v588_v7 = vadd.f32 %v587_v6, %v405_v4  ;;  %v589_v8 = vpop.f32.mrb[23].mxu0  ;;  %829 = vmatpush1.bf16.msra.mxu1 %v652_v61  ;;  %v632_v10 = vmax.f32 %v584_v2, 0.0 }
 0x122   : > { %v590_v9 = vadd.f32 %v589_v8, %v405_v4  ;;  %v633_v12 = vmax.f32 %v586_v5, 0.0 }
 0x123   : > { %v634_v11 = vmax.f32 %v588_v7, 0.0  ;;  %v705_v7 = vpop.permute.xlu0 %704 }
 0x124   : > { %v635_v13 = vmax.f32 %v590_v9, 0.0 }
 0x125   : > { %v654_v14 = vpack.c.bf16 %v634_v11, %v632_v10 }
 0x126   : > { %v655_v16 = vpack.c.bf16 %v635_v13, %v633_v12  ;;  %v593_v17 = vpop.f32.mrb[24].mxu0  ;;  %v710_v12 = vpop.permute.xlu1 %709 }
 0x127   : > { %v594_v18 = vadd.f32 %v593_v17, %v410_v15  ;;  %v595_v19 = vpop.f32.mrb[25].mxu0 }
 0x128   : > { %v596_v21 = vadd.f32 %v595_v19, %v410_v15  ;;  %v597_v22 = vpop.f32.mrb[26].mxu0  ;;  %830 = vmatprep.subr.bf16.mxu1 %v655_v16 }
 0x129   : > { %v598_v23 = vadd.f32 %v597_v22, %v415_v20  ;;  %v599_v24 = vpop.f32.mrb[27].mxu0  ;;  %831 = vmatpush1.bf16.msra.mxu1 %v654_v14  ;;  %v636_v26 = vmax.f32 %v594_v18, 0.0 }
 0x12a   : > { %v600_v25 = vadd.f32 %v599_v24, %v415_v20  ;;  %v637_v28 = vmax.f32 %v596_v21, 0.0 }
 0x12b   : > { %v638_v27 = vmax.f32 %v598_v23, 0.0  ;;  %v715_v23 = vpop.permute.xlu0 %714 }
 0x12c   : > { %v639_v29 = vmax.f32 %v600_v25, 0.0 }
 0x12d   : > { %v656_v30 = vpack.c.bf16 %v638_v27, %v636_v26 }
 0x12e   : > { %v657_v32 = vpack.c.bf16 %v639_v29, %v637_v28  ;;  %v603_v33 = vpop.f32.mrb[28].mxu0  ;;  %v720_v28 = vpop.permute.xlu1 %719 }
 0x12f   : > { %v604_v34 = vadd.f32 %v603_v33, %v420_v31  ;;  %v605_v35 = vpop.f32.mrb[29].mxu0 }
 0x130   : > { %v606_v37 = vadd.f32 %v605_v35, %v420_v31  ;;  %v607_v38 = vpop.f32.mrb[30].mxu0  ;;  %832 = vmatprep.subr.bf16.mxu1 %v657_v32 }
 0x131   : > { %v608_v39 = vadd.f32 %v607_v38, %v425_v36  ;;  %v609_v40 = vpop.f32.mrb[31].mxu0  ;;  %833 = vmatpush1.bf16.msra.mxu1 %v656_v30  ;;  %v640_v42 = vmax.f32 %v604_v34, 0.0 }
 0x132   : > { %v610_v41 = vadd.f32 %v609_v40, %v425_v36  ;;  %v641_v44 = vmax.f32 %v606_v37, 0.0 }
 0x133   : > { %v642_v43 = vmax.f32 %v608_v39, 0.0  ;;  %v725_v39 = vpop.permute.xlu0 %724 }
 0x134   : > { %v643_v45 = vmax.f32 %v610_v41, 0.0 }
 0x135   : > { %v658_v46 = vpack.c.bf16 %v642_v43, %v640_v42 }
 0x136   : > { %v659_v47 = vpack.c.bf16 %v643_v45, %v641_v44  ;;  %v730_v44 = vpop.permute.xlu1 %729 }
 0x138   : > { %834 = vmatprep.subr.bf16.mxu1 %v659_v47 }
 0x139   : > { %835 = vmatpush1.bf16.msra.mxu1 %v658_v46 }
 0x13c   : > { %853 = vmatmul.mubr.bf16.vlgmr.msra.gmra.mrb[0].mxu1 %v1212_v48 }
 0x13d   : > { %862 = vmatprep.mubr.bf16.mxu1 %v1284_v0 }
 0x144   : > { %863 = vmatmul.mubr.bf16.gmra.mrb[4].mxu1 %v1213_v49 }
 0x145   : > { %872 = vmatprep.mubr.bf16.mxu1 %v1284_v0 }
 0x14c   : > { %873 = vmatmul.mubr.bf16.gmra.mrb[8].mxu1 %v1214_v50 }
 0x14d   : > { %882 = vmatprep.mubr.bf16.mxu1 %v1284_v0 }
 0x154   : > { %883 = vmatmul.mubr.bf16.gmra.mrb[12].mxu1 %v1215_v51 }
 0x155   : > { %892 = vmatprep.mubr.bf16.mxu1 %v1284_v0 }
 0x15c   : > { %893 = vmatmul.mubr.bf16.gmra.mrb[16].mxu1 %v1216_v52 }
 0x15d   : > { %902 = vmatprep.mubr.bf16.mxu1 %v1284_v0 }
 0x164   : > { %903 = vmatmul.mubr.bf16.gmra.mrb[20].mxu1 %v1217_v53 }
 0x165   : > { %912 = vmatprep.mubr.bf16.mxu1 %v1284_v0 }
 0x16c   : > { %913 = vmatmul.mubr.bf16.gmra.mrb[24].mxu1 %v1218_v54 }
 0x16d   : > { %922 = vmatprep.mubr.bf16.mxu1 %v1284_v0 }
 0x174   : > { %923 = vmatmul.mubr.bf16.gmra.mrb[28].mxu1 %v1219_v55  ;;  %v735_v55 = vpop.permute.xlu0 %734 }
 0x20f   : > { %v854_v57 = vpop.f32.mrb[0].mxu1 }
 0x210   : > { %v855_v58 = vadd.f32 %v854_v57, %v695_v56  ;;  %v856_v59 = vpop.f32.mrb[1].mxu1 }
 0x211   : > { %v857_v61 = vadd.f32 %v856_v59, %v695_v56  ;;  %v858_v62 = vpop.f32.mrb[2].mxu1 }
 0x212   : > { %v859_v63 = vadd.f32 %v858_v62, %v700_v60  ;;  %v860_v1 = vpop.f32.mrb[3].mxu1  ;;  %v933_v3 = vmax.f32 %v855_v58, 0.0 }
 0x213   : > { %v861_v2 = vadd.f32 %v860_v1, %v700_v60  ;;  %v934_v5 = vmax.f32 %v857_v61, 0.0  ;;  %v740_v60 = vpop.permute.xlu1 %739 }
 0x214   : > { %v935_v4 = vmax.f32 %v859_v63, 0.0 }
 0x215   : > { %v936_v6 = vmax.f32 %v861_v2, 0.0 }
 0x216   : > { %v965_v0 = vpack.c.bf16 %v935_v4, %v933_v3 }
 0x217   : > { %v966_v8 = vpack.c.bf16 %v936_v6, %v934_v5  ;;  %v864_v9 = vpop.f32.mrb[4].mxu1 }
 0x218   : > { %v865_v10 = vadd.f32 %v864_v9, %v705_v7  ;;  %v866_v11 = vpop.f32.mrb[5].mxu1 }
 0x219   : > { %v867_v13 = vadd.f32 %v866_v11, %v705_v7  ;;  %v868_v14 = vpop.f32.mrb[6].mxu1  ;;  %984 = vmatprep.subr.bf16.mxu0 %v966_v8  ;;  %v745_v7 = vpop.permute.xlu0 %744 }
 0x21a   : > { %v869_v15 = vadd.f32 %v868_v14, %v710_v12  ;;  %v870_v16 = vpop.f32.mrb[7].mxu1  ;;  %985 = vmatpush1.bf16.msra.mxu0 %v965_v0  ;;  %v937_v18 = vmax.f32 %v865_v10, 0.0 }
 0x21b   : > { %v871_v17 = vadd.f32 %v870_v16, %v710_v12  ;;  %v938_v20 = vmax.f32 %v867_v13, 0.0  ;;  %v750_v12 = vpop.permute.xlu1 %749 }
 0x21c   : > { %v939_v19 = vmax.f32 %v869_v15, 0.0 }
 0x21d   : > { %v940_v21 = vmax.f32 %v871_v17, 0.0 }
 0x21e   : > { %v967_v22 = vpack.c.bf16 %v939_v19, %v937_v18 }
 0x21f   : > { %v968_v24 = vpack.c.bf16 %v940_v21, %v938_v20  ;;  %v874_v25 = vpop.f32.mrb[8].mxu1 }
 0x220   : > { %v875_v26 = vadd.f32 %v874_v25, %v715_v23  ;;  %v876_v27 = vpop.f32.mrb[9].mxu1 }
 0x221   : > { %v877_v29 = vadd.f32 %v876_v27, %v715_v23  ;;  %v878_v30 = vpop.f32.mrb[10].mxu1  ;;  %986 = vmatprep.subr.bf16.mxu0 %v968_v24  ;;  %v755_v23 = vpop.permute.xlu0 %754 }
 0x222   : > { %v879_v31 = vadd.f32 %v878_v30, %v720_v28  ;;  %v880_v32 = vpop.f32.mrb[11].mxu1  ;;  %987 = vmatpush1.bf16.msra.mxu0 %v967_v22  ;;  %v941_v34 = vmax.f32 %v875_v26, 0.0 }
 0x223   : > { %v881_v33 = vadd.f32 %v880_v32, %v720_v28  ;;  %v942_v36 = vmax.f32 %v877_v29, 0.0  ;;  %v760_v28 = vpop.permute.xlu1 %759 }
 0x224   : > { %v943_v35 = vmax.f32 %v879_v31, 0.0 }
 0x225   : > { %v944_v37 = vmax.f32 %v881_v33, 0.0 }
 0x226   : > { %v969_v38 = vpack.c.bf16 %v943_v35, %v941_v34 }
 0x227   : > { %v970_v40 = vpack.c.bf16 %v944_v37, %v942_v36  ;;  %v884_v41 = vpop.f32.mrb[12].mxu1 }
 0x228   : > { %v885_v42 = vadd.f32 %v884_v41, %v725_v39  ;;  %v886_v43 = vpop.f32.mrb[13].mxu1 }
 0x229   : > { %v887_v45 = vadd.f32 %v886_v43, %v725_v39  ;;  %v888_v46 = vpop.f32.mrb[14].mxu1  ;;  %988 = vmatprep.subr.bf16.mxu0 %v970_v40  ;;  %v765_v39 = vpop.permute.xlu0 %764 }
 0x22a   : > { %v889_v47 = vadd.f32 %v888_v46, %v730_v44  ;;  %v890_v48 = vpop.f32.mrb[15].mxu1  ;;  %989 = vmatpush1.bf16.msra.mxu0 %v969_v38  ;;  %v945_v50 = vmax.f32 %v885_v42, 0.0 }
 0x22b   : > { %v891_v49 = vadd.f32 %v890_v48, %v730_v44  ;;  %v946_v52 = vmax.f32 %v887_v45, 0.0  ;;  %v770_v44 = vpop.permute.xlu1 %769 }
 0x22c   : > { %v947_v51 = vmax.f32 %v889_v47, 0.0 }
 0x22d   : > { %v948_v53 = vmax.f32 %v891_v49, 0.0 }
 0x22e   : > { %v971_v54 = vpack.c.bf16 %v947_v51, %v945_v50 }
 0x22f   : > { %v972_v56 = vpack.c.bf16 %v948_v53, %v946_v52  ;;  %v894_v57 = vpop.f32.mrb[16].mxu1 }
 0x230   : > { %v895_v58 = vadd.f32 %v894_v57, %v735_v55  ;;  %v896_v59 = vpop.f32.mrb[17].mxu1  ;;  %v1285_v57 = vmov 1966171168  }
 0x231   : > { %v897_v61 = vadd.f32 %v896_v59, %v735_v55  ;;  %v898_v62 = vpop.f32.mrb[18].mxu1  ;;  %990 = vmatprep.subr.bf16.mxu0 %v972_v56  ;;  %v981_v56 = vld [vmem:[%s1608_s5] sm:$0x1]  ;;  %v1031_v59 = vlaneseq }
 0x232   : > { %v899_v63 = vadd.f32 %v898_v62, %v740_v60  ;;  %v900_v1 = vpop.f32.mrb[19].mxu1  ;;  %991 = vmatpush1.bf16.msra.mxu0 %v971_v54  ;;  %v949_v3 = vmax.f32 %v895_v58, 0.0  ;;  %v1029_v58 = vunpack.c.l.s4 %v1285_v57 }
 0x233   : > { %v901_v2 = vadd.f32 %v900_v1, %v740_v60  ;;  %v950_v5 = vmax.f32 %v897_v61, 0.0  ;;  %v983_v60 = vstv %s982_s9  ;;  %v1032_v62 = vshrl.u32 %v1031_v59, 7 }
 0x234   : > { %v951_v4 = vmax.f32 %v899_v63, 0.0  ;;  %v1030_v61 = vunpack.c.0.s8 %v1029_v58  ;;  %vm1045_vm2 = vcmp.lt.s32.totalorder %v1031_v59, 256 }
 0x235   : > { %v952_v6 = vmax.f32 %v901_v2, 0.0 }
 0x236   : > { %v973_v0 = vpack.c.bf16 %v951_v4, %v949_v3  ;;  %v1033_v4 = vsub.s32 %v1030_v61, %v1032_v62 }
 0x237   : > { %v974_v8 = vpack.c.bf16 %v952_v6, %v950_v5  ;;  %v904_v9 = vpop.f32.mrb[20].mxu1 }
 0x238   : > { %v905_v10 = vadd.f32 %v904_v9, %v745_v7  ;;  %v906_v11 = vpop.f32.mrb[21].mxu1 }
 0x239   : > { %v907_v13 = vadd.f32 %v906_v11, %v745_v7  ;;  %v908_v14 = vpop.f32.mrb[22].mxu1  ;;  %992 = vmatprep.subr.bf16.mxu0 %v974_v8 }
 0x23a   : > { %v909_v15 = vadd.f32 %v908_v14, %v750_v12  ;;  %v910_v16 = vpop.f32.mrb[23].mxu1  ;;  %993 = vmatpush1.bf16.msra.mxu0 %v973_v0  ;;  %v953_v18 = vmax.f32 %v905_v10, 0.0 }
 0x23b   : > { %v911_v17 = vadd.f32 %v910_v16, %v750_v12  ;;  %v954_v20 = vmax.f32 %v907_v13, 0.0 }
 0x23c   : > { %v955_v19 = vmax.f32 %v909_v15, 0.0 }
 0x23d   : > { %v956_v21 = vmax.f32 %v911_v17, 0.0 }
 0x23e   : > { %v975_v22 = vpack.c.bf16 %v955_v19, %v953_v18 }
 0x23f   : > { %v976_v24 = vpack.c.bf16 %v956_v21, %v954_v20  ;;  %v914_v25 = vpop.f32.mrb[24].mxu1 }
 0x240   : > { %v915_v26 = vadd.f32 %v914_v25, %v755_v23  ;;  %v916_v27 = vpop.f32.mrb[25].mxu1 }
 0x241   : > { %v917_v29 = vadd.f32 %v916_v27, %v755_v23  ;;  %v918_v30 = vpop.f32.mrb[26].mxu1  ;;  %994 = vmatprep.subr.bf16.mxu0 %v976_v24 }
 0x242   : > { %v919_v31 = vadd.f32 %v918_v30, %v760_v28  ;;  %v920_v32 = vpop.f32.mrb[27].mxu1  ;;  %995 = vmatpush1.bf16.msra.mxu0 %v975_v22  ;;  %v957_v34 = vmax.f32 %v915_v26, 0.0 }
 0x243   : > { %v921_v33 = vadd.f32 %v920_v32, %v760_v28  ;;  %v958_v36 = vmax.f32 %v917_v29, 0.0 }
 0x244   : > { %v959_v35 = vmax.f32 %v919_v31, 0.0 }
 0x245   : > { %v960_v37 = vmax.f32 %v921_v33, 0.0 }
 0x246   : > { %v977_v38 = vpack.c.bf16 %v959_v35, %v957_v34 }
 0x247   : > { %v978_v40 = vpack.c.bf16 %v960_v37, %v958_v36  ;;  %v924_v41 = vpop.f32.mrb[28].mxu1 }
 0x248   : > { %v925_v42 = vadd.f32 %v924_v41, %v765_v39  ;;  %v926_v43 = vpop.f32.mrb[29].mxu1 }
 0x249   : > { %v927_v45 = vadd.f32 %v926_v43, %v765_v39  ;;  %v928_v46 = vpop.f32.mrb[30].mxu1  ;;  %996 = vmatprep.subr.bf16.mxu0 %v978_v40 }
 0x24a   : > { %v929_v47 = vadd.f32 %v928_v46, %v770_v44  ;;  %v930_v48 = vpop.f32.mrb[31].mxu1  ;;  %997 = vmatpush1.bf16.msra.mxu0 %v977_v38  ;;  %v961_v50 = vmax.f32 %v925_v42, 0.0 }
 0x24b   : > { %v931_v49 = vadd.f32 %v930_v48, %v770_v44  ;;  %v962_v52 = vmax.f32 %v927_v45, 0.0 }
 0x24c   : > { %v963_v51 = vmax.f32 %v929_v47, 0.0 }
 0x24d   : > { %v964_v53 = vmax.f32 %v931_v49, 0.0 }
 0x24e   : > { %v979_v54 = vpack.c.bf16 %v963_v51, %v961_v50 }
 0x24f   : > { %v980_v55 = vpack.c.bf16 %v964_v53, %v962_v52 }
 0x251   : > { %998 = vmatprep.subr.bf16.mxu0 %v980_v55 }
 0x252   : > { %999 = vmatpush1.bf16.msra.mxu0 %v979_v54 }
 0x255   : > { %1017 = vmatmul.mubr.bf16.vlgmr.msra.gmra.mrb[32].mxu0 %v981_v56 }
 0x328   : > { %v1018_v63 = vpop.f32.mrb[32].mxu0 }
 0x329   : > { %v1019_v1 = vadd.f32 %v1018_v63, %v983_v60  ;;  %v1020_v2 = vpop.f32.mrb[33].mxu0 }
 0x32a   : > { %v1021_v3 = vadd.f32 %v1020_v2, %v983_v60  ;;  %v1022_v5 = vpop.f32.mrb[34].mxu0 }
 0x32b   : > { %v1023_v6 = vpop.f32.mrb[35].mxu0 }
 0x32c   : > { %v1027_v0 = vcombine.low %v1019_v1, %v1021_v3 }
 0x32e   : > { %v1034_v7 = vrot.slane %v1027_v0, %v1033_v4 }
 0x330   : > { %v1041_v8 = vrot.slane %v1034_v7, %v1033_v4 }
 0x332   : > { %1047 = vst.msk [vmem:[%s285_s16] sm:$0x3] %vm1045_vm2, %v1041_v8 }
 0x333   : > { %1233 = shalt.err (!%p1230_p3)
}
 0x334   : > { %s1234_s25 = scalar_lea.hbm %s1561_s20, 32  ;;  %s1238_s10 = scalar_lea.hbm %s1610_s7, 64 }
 0x335   : > { %p1235_p4 = scmp.ne.s32.totalorder %s1561_s20, %s1234_s25  ;;  %p1239_p9 = scmp.lt.u32.totalorder %s1561_s20, %s1610_s7 }
 0x336   : > { %p1240_p10 = scmp.lt.u32.totalorder %s1238_s10, %s1234_s25  ;;  %p1242_p12 = scmp.lt.u32.totalorder %s1234_s25, %s1561_s20 }
 0x337   : > { %p1236_p7 = pnand %p1235_p4, %p1368_p5 }
 0x338   : > { %p1241_p11 = por %p1240_p10, %p1239_p9 }
 0x339   : > { %p1237_p8 = pneg %p1236_p7 }
 0x33a   : > { %p1243_p13 = por %p1242_p12, %p1241_p11 }
 0x33c   : > { %p1244_p0 = pnand %p1243_p13, %p1237_p8 }
 0x33e   : > { %1247 = shalt.err (!%p1244_p0)
}
 0x33f   : > { %1161 = dma.vmem_to_hbm [thread:$0]  (%p1368_p5), %s1563_s17, 32, %s1561_s20, %s1049_s21  }
 0x340 PF: > { %p1167_p1 = scmp.ge.s32.totalorder %s1282_s29, 2  ;;  %s1075_s16 = sand.u32 1, %s1270_s26  }
 0x341   : > { %s1076_s18 = scalar_lea.sflag [#allocation4], %s1075_s16 }
 0x342   : > { %p1164_p2 = pnand %p1167_p1, %p1372_p6 }
 0x344   : > { %1265 = dma.done.wait (!%p1164_p2), %s1076_s18, 32  }
 0x345   : > { %1267 = vsyncadd (!%p1164_p2), %s1076_s18, 4294967264  ;;  %p18_p3 = scmp.ge.s32.totalorder %s1355_s8, 4   ;;  %s1613_s26 = smov %s1274_s27 }
 0x346   : > { %s1614_s27 = smov %s1278_s28  ;;  %s1615_s28 = smov %s1366_s11 }
 0x347   : > { %s1616_s29 = smov %s1355_s8  ;;  %20 = sbr.rel (!%p18_p3) target bundleno = 5 (0x5), region = 83 }
 0x34e   :  { %1081 = vsyncpa [#allocation4], 1 }
 0x34f   :  { %1083 = vsyncpa [#allocation4 + $0x1], 1 }

</bundles_post_ra>
